<compile_context>
chip_gen: v7x
topology: tpu7x:2x2x1
jax: 0.10.0
libtpu: 0.0.40
codegen_flags: <defaults>
</compile_context>

<pallas_src>
import math

import jax
import jax.numpy as jnp
from jax.experimental import pallas as pl
from jax.experimental.pallas import tpu as pltpu


_INV_SQRT2 = 1.0 / math.sqrt(2.0)


def _erf_poly(x):
    # Abramowitz & Stegun 7.1.26; max abs error ~1.5e-7 (well inside f32 noise).
    p = 0.3275911
    a1, a2, a3, a4, a5 = 0.254829592, -0.284496736, 1.421413741, -1.453152027, 1.061405429
    ax = jnp.abs(x)
    t = 1.0 / (1.0 + p * ax)
    poly = ((((a5 * t + a4) * t + a3) * t + a2) * t + a1) * t
    y = 1.0 - poly * jnp.exp(-(ax * ax))
    return jnp.where(x < 0.0, -y, y)


def _linear_gelu_softmax_kernel(x_ref, w_ref, b_ref, o_ref):
    # x: [B, K] f32, w: [N, K] f32 (PyTorch layout). Contract K with K -> [B, N],
    # f32 accumulation on the MXU.
    z = jax.lax.dot_general(
        x_ref[...],
        w_ref[...],
        dimension_numbers=(((1,), (1,)), ((), ())),
        preferred_element_type=jnp.float32,
    )
    z = z + b_ref[...]  # (1, N) broadcast over (B, N)

    # Exact GELU (matches torch.nn.functional.gelu default): 0.5*z*(1+erf(z/sqrt(2)))
    g = 0.5 * z * (1.0 + _erf_poly(z * _INV_SQRT2))

    # Numerically stable softmax along the feature axis (dim=1).
    m = jnp.max(g, axis=-1, keepdims=True)
    e = jnp.exp(g - m)
    denom = jnp.sum(e, axis=-1, keepdims=True)
    o_ref[...] = (e / denom).astype(o_ref.dtype)


@jax.jit
def linear_gelu_softmax(x, weight, bias):
    """x: [B, K] f32; weight: [N, K] f32 (PyTorch layout); bias: [N] f32 -> [B, N] f32."""
    B, K = x.shape
    N, K2 = weight.shape
    assert K == K2 and bias.shape == (N,)
    b2 = bias.reshape(1, N)  # metadata-only reshape inside the jit

    vmem = pl.BlockSpec(memory_space=pltpu.MemorySpace.VMEM)
    return pl.pallas_call(
        _linear_gelu_softmax_kernel,
        out_shape=jax.ShapeDtypeStruct((B, N), jnp.float32),
        in_specs=[vmem, vmem, vmem],
        out_specs=vmem,
    )(x, weight, b2)

    # TODO(synk): if B/N/K grow, add a grid over batch tiles ("parallel" axis, lane-dense
    # N in the out_spec) and bf16 matmul operands; at 8x100x10 a single VMEM block wins.


def _reference(x, weight, bias):
    z = x @ weight.T + bias
    g = 0.5 * z * (1.0 + jax.lax.erf(z / jnp.sqrt(2.0).astype(jnp.float32)))
    return jax.nn.softmax(g, axis=1)


if __name__ == "__main__":
    in_features = 100
    out_features = 10
    batch = 8

    key = jax.random.PRNGKey(0)
    kx, kw, kb = jax.random.split(key, 3)

    # Deterministic parameter init (nn.Linear-style uniform bounds).
    bound = 1.0 / math.sqrt(in_features)
    weight = jax.random.uniform(kw, (out_features, in_features), jnp.float32, -bound, bound)
    bias = jax.random.uniform(kb, (out_features,), jnp.float32, -bound, bound)
    x = jax.random.normal(kx, (batch, in_features), jnp.float32)

    out = jax.block_until_ready(linear_gelu_softmax(x, weight, bias))

    ref = _reference(x, weight, bias)
    assert out.shape == (batch, out_features)
    assert bool(jnp.all(jnp.isfinite(out))), "non-finite output"
    assert jnp.allclose(out, ref, atol=1e-4, rtol=1e-4), "mismatch vs reference"

    print("KERNEL_OK")
</pallas_src>

<mosaic_0001>
module attributes {stable_mosaic.version = 11 : i64} {
  func.func @_linear_gelu_softmax_kernel(%arg0: memref<8x100xf32, #tpu.memory_space<vmem>>, %arg1: memref<10x100xf32, #tpu.memory_space<vmem>>, %arg2: memref<1x10xf32, #tpu.memory_space<vmem>>, %arg3: memref<8x10xf32, #tpu.memory_space<vmem>>) attributes {dimension_semantics = [], scalar_prefetch = 0 : i64, scratch_operands = 0 : i64, tpu.core_type = #tpu.core_type<tc>} {
    %c0 = arith.constant 0 : index
    %c0_0 = arith.constant 0 : index
    %0 = vector.load %arg0[%c0, %c0_0] : memref<8x100xf32, #tpu.memory_space<vmem>>, vector<8x100xf32>
    %c0_1 = arith.constant 0 : index
    %c0_2 = arith.constant 0 : index
    %1 = vector.load %arg1[%c0_1, %c0_2] : memref<10x100xf32, #tpu.memory_space<vmem>>, vector<10x100xf32>
    %cst = arith.constant dense<0.000000e+00> : vector<8x10xf32>
    %2 = tpu.matmul %0, %1, %cst {dimension_numbers = #tpu.dot_dimension_numbers<[1], [1], [0], [0], [0, 0, 1, 0], [], []>} : vector<8x100xf32>, vector<10x100xf32>, vector<8x10xf32> -> vector<8x10xf32>
    %c0_3 = arith.constant 0 : index
    %c0_4 = arith.constant 0 : index
    %3 = vector.load %arg2[%c0_3, %c0_4] : memref<1x10xf32, #tpu.memory_space<vmem>>, vector<1x10xf32>
    %4 = vector.broadcast %3 : vector<1x10xf32> to vector<8x10xf32>
    %5 = arith.addf %2, %4 : vector<8x10xf32>
    %cst_5 = arith.constant 5.000000e-01 : f32
    %6 = vector.broadcast %cst_5 : f32 to vector<8x10xf32>
    %7 = arith.mulf %6, %5 : vector<8x10xf32>
    %cst_6 = arith.constant 0.707106769 : f32
    %8 = vector.broadcast %cst_6 : f32 to vector<8x10xf32>
    %9 = arith.mulf %5, %8 : vector<8x10xf32>
    %10 = math.absf %9 : vector<8x10xf32>
    %cst_7 = arith.constant 0.327591091 : f32
    %11 = vector.broadcast %cst_7 : f32 to vector<8x10xf32>
    %12 = arith.mulf %11, %10 : vector<8x10xf32>
    %cst_8 = arith.constant 1.000000e+00 : f32
    %13 = vector.broadcast %cst_8 : f32 to vector<8x10xf32>
    %14 = arith.addf %13, %12 : vector<8x10xf32>
    %cst_9 = arith.constant 1.000000e+00 : f32
    %15 = vector.broadcast %cst_9 : f32 to vector<8x10xf32>
    %16 = arith.divf %15, %14 : vector<8x10xf32>
    %cst_10 = arith.constant 1.06140542 : f32
    %17 = vector.broadcast %cst_10 : f32 to vector<8x10xf32>
    %18 = arith.mulf %17, %16 : vector<8x10xf32>
    %cst_11 = arith.constant -1.45315206 : f32
    %19 = vector.broadcast %cst_11 : f32 to vector<8x10xf32>
    %20 = arith.addf %18, %19 : vector<8x10xf32>
    %21 = arith.mulf %20, %16 : vector<8x10xf32>
    %cst_12 = arith.constant 1.42141378 : f32
    %22 = vector.broadcast %cst_12 : f32 to vector<8x10xf32>
    %23 = arith.addf %21, %22 : vector<8x10xf32>
    %24 = arith.mulf %23, %16 : vector<8x10xf32>
    %cst_13 = arith.constant -0.284496725 : f32
    %25 = vector.broadcast %cst_13 : f32 to vector<8x10xf32>
    %26 = arith.addf %24, %25 : vector<8x10xf32>
    %27 = arith.mulf %26, %16 : vector<8x10xf32>
    %cst_14 = arith.constant 0.254829586 : f32
    %28 = vector.broadcast %cst_14 : f32 to vector<8x10xf32>
    %29 = arith.addf %27, %28 : vector<8x10xf32>
    %30 = arith.mulf %29, %16 : vector<8x10xf32>
    %31 = arith.mulf %10, %10 : vector<8x10xf32>
    %cst_15 = arith.constant 0.000000e+00 : f32
    %32 = vector.broadcast %cst_15 : f32 to vector<8x10xf32>
    %33 = arith.subf %32, %31 : vector<8x10xf32>
    %34 = math.exp %33 : vector<8x10xf32>
    %35 = arith.mulf %30, %34 : vector<8x10xf32>
    %cst_16 = arith.constant 1.000000e+00 : f32
    %36 = vector.broadcast %cst_16 : f32 to vector<8x10xf32>
    %37 = arith.subf %36, %35 : vector<8x10xf32>
    %cst_17 = arith.constant 0.000000e+00 : f32
    %38 = vector.broadcast %cst_17 : f32 to vector<8x10xf32>
    %39 = arith.cmpf olt, %9, %38 : vector<8x10xf32>
    %cst_18 = arith.constant 0.000000e+00 : f32
    %40 = vector.broadcast %cst_18 : f32 to vector<8x10xf32>
    %41 = arith.subf %40, %37 : vector<8x10xf32>
    %42 = arith.select %39, %41, %37 : vector<8x10xi1>, vector<8x10xf32>
    %cst_19 = arith.constant 1.000000e+00 : f32
    %43 = vector.broadcast %cst_19 : f32 to vector<8x10xf32>
    %44 = arith.addf %43, %42 : vector<8x10xf32>
    %45 = arith.mulf %7, %44 : vector<8x10xf32>
    %cst_20 = arith.constant dense<0xFF800000> : vector<8xf32>
    %46 = vector.multi_reduction <maximumf>, %45, %cst_20 [1] : vector<8x10xf32> to vector<8xf32>
    %47 = vector.shape_cast %46 : vector<8xf32> to vector<8x1xf32>
    %48 = vector.broadcast %47 : vector<8x1xf32> to vector<8x10xf32>
    %49 = arith.subf %45, %48 : vector<8x10xf32>
    %50 = math.exp %49 : vector<8x10xf32>
    %cst_21 = arith.constant dense<0.000000e+00> : vector<8xf32>
    %51 = vector.multi_reduction <add>, %50, %cst_21 [1] : vector<8x10xf32> to vector<8xf32>
    %52 = vector.shape_cast %51 : vector<8xf32> to vector<8x1xf32>
    %53 = vector.broadcast %52 : vector<8x1xf32> to vector<8x10xf32>
    %54 = arith.divf %50, %53 : vector<8x10xf32>
    %c0_22 = arith.constant 0 : index
    %c0_23 = arith.constant 0 : index
    %55 = vector.load %arg3[%c0_22, %c0_23] : memref<8x10xf32, #tpu.memory_space<vmem>>, vector<8x10xf32>
    tpu.vector_store %arg3[%c0_22, %c0_23], %54 {strides = array<i32>} : memref<8x10xf32, #tpu.memory_space<vmem>>, vector<8x10xf32>,
    return
  }
}

</mosaic_0001>

<bundles_post_ra>
// kernel: linear_gelu_softmax.1
= control target key start
LH: loop header
LB: loop body
LE: loop exit
PB: predicated region body
PF: predicated region fallthrough
CT: control target
= control target key end

     0   :  { %8 = vsyncpa [#allocation3], 0  ;;  %s370_s0 = inlined_call_operand.hbm [shape: f32[8,100], index: 0, kind: input, shape index: {}]   ;;  %s371_s1 = inlined_call_operand.hbm [shape: f32[10,100], index: 1, kind: input, shape index: {}]   ;;  %s372_s2 = inlined_call_operand.vmem [shape: f32[1,10], index: 2, kind: input, shape index: {}]   ;;  %s373_s3 = inlined_call_operand.hbm [shape: f32[8,10], index: 3, kind: output, shape index: {}]  }
   0x1   :  { %9 = vsyncpa [#allocation6], 0 }
   0x2   :  { %10 = vsyncpa [#allocation4], 0  ;;  %s293_s12 = smov [#allocation2]   ;;  %s294_s14 = smov [#allocation5]  }
   0x3   :  { %s17_s13 = sshll.u32 %s293_s12, 4  ;;  %s26_s15 = sshll.u32 %s294_s14, 4  ;;  %s18_s13 = int_to_ptr.vmem [resolvable:$true] %s17_s13  ;;  %s321_s15 = int_to_ptr.vmem [resolvable:$true] %s26_s15 }
   0x4   :  { %s221_s18 = scalar_lea.hbm %s370_s0, 128 }
   0x5   :  { %p222_p0 = scmp.ne.s32.totalorder %s370_s0, %s221_s18  ;;  %p225_p1 = scmp.lt.u32.totalorder %s221_s18, %s370_s0 }
   0x7   :  { %p227_p2 = pnand %p225_p1, %p222_p0 }
   0x9   :  { %230 = shalt.err (!%p227_p2)
}
   0xa   :  { %s231_s23 = scalar_lea.vmem %s18_s13, 128  ;;  %p236_p4 = scmp.lt.s32.totalorder %s18_s13, %s18_s13 }
   0xb   :  { %p232_p3 = scmp.ne.s32.totalorder %s18_s13, %s231_s23  ;;  %p237_p5 = scmp.lt.s32.totalorder %s231_s23, %s231_s23 }
   0xd   :  { %p238_p6 = por %p237_p5, %p236_p4 }
   0xf   :  { %p239_p7 = pnand %p238_p6, %p232_p3 }
  0x11   :  { %242 = shalt.err (!%p239_p7)
}
  0x12   :  { %20 = dma.hbm_to_vmem [thread:$0]  %s370_s0, 128, %s18_s13, [#allocation3]  }
  0x13   :  { %s243_s28 = scalar_lea.hbm %s371_s1, 256 }
  0x14   :  { %p244_p8 = scmp.ne.s32.totalorder %s371_s1, %s243_s28  ;;  %p247_p9 = scmp.lt.u32.totalorder %s243_s28, %s371_s1 }
  0x16   :  { %p249_p10 = pnand %p247_p9, %p244_p8 }
  0x18   :  { %252 = shalt.err (!%p249_p10)
}
  0x19   :  { %s253_s6 = scalar_lea.vmem %s321_s15, 256  ;;  %p258_p12 = scmp.lt.s32.totalorder %s321_s15, %s321_s15 }
  0x1a   :  { %p254_p11 = scmp.ne.s32.totalorder %s321_s15, %s253_s6  ;;  %p259_p13 = scmp.lt.s32.totalorder %s253_s6, %s253_s6 }
  0x1c   :  { %p260_p0 = por %p259_p13, %p258_p12 }
  0x1e   :  { %p261_p1 = pnand %p260_p0, %p254_p11 }
  0x20   :  { %264 = shalt.err (!%p261_p1)
}
  0x21   :  { %s295_s0 = smov 128   ;;  %s296_s7 = smov 8  }
  0x22   :  { %32 = dma.hbm_to_vmem [thread:$0]  %s371_s1, 256, %s321_s15, [#allocation6], %s295_s0, %s295_s0, %s296_s7  }
  0x23   :  { %287 = dma.done.wait [#allocation3], 128  }
  0x24   :  { %288 = vsyncadd [#allocation3], 4294967168 }
  0x25   :  { %289 = dma.done.wait [#allocation6], 256  }
  0x26   :  { %290 = vsyncadd [#allocation6], 4294967040  ;;  %v297_v0 = vmov 0.0|0.0   ;;  %vm298_vm0 = vmmov 0   ;;  %v299_v1 = vmov 0.0   ;;  %vm51_vm1 = vcmask 818176  }
  0x27   :  { %201 = vmatprep.subr.bf16.mxu0 %v297_v0  ;;  %198 = vmatprep.mubr.msk.f32.mxu0 %vm298_vm0, %v299_v1  ;;  %v42_v2 = vld [vmem:[#allocation5] sm:$0xff]  ;;  %v43_v3 = vld [vmem:[#allocation5 + $0x8] sm:$0x3]  ;;  %vm203_vm2 = vmpackc.low %vm51_vm1, %vm51_vm1  ;;  %vm158_vm4 = vcmask 80896   ;;  %s300_s1 = smov [#allocation7]  }
  0x28   :  { %v202_v4 = vpack.c.bf16 %v43_v3, %v42_v2  ;;  %v41_v5 = vld [vmem:[#allocation2] sm:$0xff] }
  0x29   :  { %v187_v6 = vld [vmem:[%s372_s2] ss:$0 sm:$0xff]  ;;  %s177_s2 = sshll.u32 %s300_s1, 4  ;;  %s178_s2 = int_to_ptr.vmem [resolvable:$true] %s177_s2 }
  0x2a   :  { %204 = vmatpush3.bf16.xpose.msk.msra.mxu0 %vm203_vm2, %v202_v4  ;;  %s265_s12 = scalar_lea.vmem %s178_s2, 128  ;;  %p270_p3 = scmp.lt.s32.totalorder %s178_s2, %s178_s2 }
  0x2b   :  { %p266_p2 = scmp.ne.s32.totalorder %s178_s2, %s265_s12  ;;  %p271_p4 = scmp.lt.s32.totalorder %s265_s12, %s265_s12 }
  0x2d   :  { %p272_p5 = por %p271_p4, %p270_p3 }
  0x2f   :  { %p273_p6 = pnand %p272_p5, %p266_p2 }
  0x31   :  { %199 = vmatmul.mubr.msk.f32.vlgmr.msra.gmra.mrb[0].mxu0 %vm51_vm1, %v41_v5 }
 0x104   :  { %v127_v7 = vpop.f32.mrb[0].mxu0 }
 0x105   :  { %v128_v8 = vadd.f32 %v187_v6, %v127_v7  ;;  %v200_v9 = vpop.f32.mrb[1].mxu0 }
 0x107   :  { %v132_v10 = vmul.f32 0.70710677, %v128_v8  ;;  %v131_v32 = vmul.f32 0.5, %v128_v8 }
 0x109   :  { %v133_v11 = vand.u32 2147483647, %v132_v10  ;;  %vm153_vm3 = vcmp.lt.f32.partialorder %v132_v10, 0.0 }
 0x10b   :  { %v134_v12 = vmul.f32 0.3275911, %v133_v11  ;;  %v147_v14 = vmul.f32 %v133_v11, %v133_v11 }
 0x10d   :  { %v135_v13 = vadd.f32 1.0, %v134_v12  ;;  %v148_v16 = vsub.f32 0.0, %v147_v14 }
 0x10f   :  { %213 = vrcp.f32 %v135_v13  ;;  %v149_v19 = vmul.f32 1.442695, %v148_v16 }
 0x111   :  { %215 = vpow2.f32 %v149_v19 }
 0x119   :  { %v214_v15 = vpop.eup %213 }
 0x11a   :  { %v138_v17 = vmul.f32 1.0614054, %v214_v15 }
 0x11b   :  { %v216_v27 = vpop.eup %215 }
 0x11c   :  { %v139_v18 = vadd.f32 -1.4531521, %v138_v17 }
 0x11e   :  { %v140_v20 = vmul.f32 %v214_v15, %v139_v18 }
 0x120   :  { %v141_v21 = vadd.f32 1.4214138, %v140_v20 }
 0x122   :  { %v142_v22 = vmul.f32 %v214_v15, %v141_v21 }
 0x124   :  { %v143_v23 = vadd.f32 -0.28449672, %v142_v22 }
 0x126   :  { %v144_v24 = vmul.f32 %v214_v15, %v143_v23 }
 0x128   :  { %v145_v25 = vadd.f32 0.2548296, %v144_v24 }
 0x12a   :  { %v146_v26 = vmul.f32 %v214_v15, %v145_v25 }
 0x12c   :  { %v151_v28 = vmul.f32 %v216_v27, %v146_v26 }
 0x12e   :  { %v152_v29 = vsub.f32 1.0, %v151_v28 }
 0x130   :  { %v154_v30 = vsub.f32 0.0, %v152_v29 }
 0x132   :  { %v155_v31 = vsel %vm153_vm3, %v154_v30, %v152_v29 }
 0x133   :  { %v156_v33 = vadd.f32 1.0, %v155_v31 }
 0x135   :  { %v157_v34 = vmul.f32 %v156_v33, %v131_v32 }
 0x137   :  { %v159_v35 = vsel %vm158_vm4, %v157_v34, -inf }
 0x138   :  { %160 = vmax.xlane.f32.xlu0 %v159_v35 }
 0x1c5   :  { %v161_v36 = vpop.xlane.xlu0 %160 }
 0x1c6   :  { %v162_v37 = vsub.f32 %v157_v34, %v161_v36 }
 0x1c8   :  { %v163_v38 = vmul.f32 1.442695, %v162_v37 }
 0x1ca   :  { %217 = vpow2.f32 %v163_v38 }
 0x1d4   :  { %v218_v39 = vpop.eup %217 }
 0x1d5   :  { %v165_v40 = vsel %vm158_vm4, %v218_v39, 0.0 }
 0x1d6   :  { %166 = vadd.xlane.f32.xlu0 %v165_v40 }
 0x263   :  { %v167_v41 = vpop.xlane.xlu0 %166 }
 0x264   :  { %219 = vrcp.f32 %v167_v41 }
 0x26e   :  { %v220_v42 = vpop.eup %219 }
 0x26f   :  { %v169_v43 = vmul.f32 %v220_v42, %v218_v39 }
 0x271   :  { %170 = vst.msk [vmem:[#allocation7] sm:$0xff] %vm158_vm4, %v169_v43 }
 0x272   :  { %276 = shalt.err (!%p273_p6)
}
 0x273   :  { %s277_s15 = scalar_lea.hbm %s373_s3, 128 }
 0x274   :  { %p278_p7 = scmp.ne.s32.totalorder %s373_s3, %s277_s15  ;;  %p281_p8 = scmp.lt.u32.totalorder %s277_s15, %s373_s3 }
 0x276   :  { %p283_p9 = pnand %p281_p8, %p278_p7 }
 0x278   :  { %286 = shalt.err (!%p283_p9)
}
 0x279   :  { %180 = dma.vmem_to_hbm [thread:$0]  %s178_s2, 128, %s373_s3, [#allocation4]  }
 0x27a   :  { %291 = dma.done.wait [#allocation4], 128  }
 0x27b   :  { %292 = vsyncadd [#allocation4], 4294967168 }
 0x27c   :  { %184 = vsyncpa [#allocation3], 1 }
 0x27d   :  { %185 = vsyncpa [#allocation6], 1 }
 0x27e   :  { %186 = vsyncpa [#allocation4], 1 }

</bundles_post_ra>
